<compile_context>
chip_gen: v7x
topology: tpu7x:2x2x1
jax: 0.10.0
libtpu: 0.0.40
codegen_flags: <defaults>
</compile_context>

<pallas_src>
import functools

import jax
import jax.numpy as jnp
from jax.experimental import pallas as pl
from jax.experimental.pallas import tpu as pltpu


HIDDEN = 256


def _critic_kernel(s_ref, a_ref,
                   w14s_ref, w14a_ref, b14_ref,
                   w2_ref, b2_ref, w5_ref, b5_ref,
                   w36_ref, b36_ref,
                   q_ref):
    # In-kernel concat:  [s | a] @ W14 == s @ W14[:S] + a @ W14[S:]
    s = s_ref[...].astype(jnp.bfloat16)
    a = a_ref[...].astype(jnp.bfloat16)

    h = (jnp.dot(s, w14s_ref[...], preferred_element_type=jnp.float32)
         + jnp.dot(a, w14a_ref[...], preferred_element_type=jnp.float32)
         + b14_ref[...])                                     # (B, 512) f32
    h = jnp.maximum(h, 0.0)

    # Lane-aligned split (boundary at 256, a multiple of 128 -> no layout cost).
    h1 = h[:, :HIDDEN].astype(jnp.bfloat16)                  # Q1 branch
    h2 = h[:, HIDDEN:].astype(jnp.bfloat16)                  # Q2 branch

    g1 = jnp.maximum(
        jnp.dot(h1, w2_ref[...], preferred_element_type=jnp.float32) + b2_ref[...],
        0.0)
    g2 = jnp.maximum(
        jnp.dot(h2, w5_ref[...], preferred_element_type=jnp.float32) + b5_ref[...],
        0.0)

    # Fused block-diagonal final layer: [g1 | g2] @ [[w3,0],[0,w6]] + [b3|b6]
    g = jnp.concatenate([g1, g2], axis=1)                    # (B, 512) f32
    q = jnp.dot(g, w36_ref[...], preferred_element_type=jnp.float32) + b36_ref[...]
    q_ref[...] = q.astype(q_ref.dtype)                       # (B, 2): q1=col0, q2=col1


def pack_params(params, state_dim):
    """One-time packing of torch-layout params into the fused kernel layout.

    params are (w1,b1,...,w6,b6) with weights stored as (in, out) (transpose of
    torch's (out, in)).  Big weights cast to bf16; f32 accumulation in-kernel.
    """
    (w1, b1, w2, b2, w3, b3, w4, b4, w5, b5, w6, b6) = params

    w14 = jnp.concatenate([w1, w4], axis=1)                  # (D, 512)
    b14 = jnp.concatenate([b1, b4], axis=1)                  # (1, 512)
    w14s = w14[:state_dim].astype(jnp.bfloat16)              # (S, 512)
    w14a = w14[state_dim:].astype(jnp.bfloat16)              # (A, 512)

    w2b = w2.astype(jnp.bfloat16)                            # (256, 256)
    w5b = w5.astype(jnp.bfloat16)                            # (256, 256)

    zeros = jnp.zeros((HIDDEN, 1), jnp.float32)
    w36 = jnp.concatenate(
        [jnp.concatenate([w3, zeros], axis=1),
         jnp.concatenate([zeros, w6], axis=1)], axis=0)      # (512, 2) block-diag
    b36 = jnp.concatenate([b3, b6], axis=1)                  # (1, 2)

    return (w14s, w14a, b14, w2b, b2, w5b, b5, w36, b36)


@functools.partial(jax.jit, static_argnames=())
def critic_forward(state, action, packed):
    """Twin-Q critic forward.  state: (B, S), action: (B, A).  Returns (q1, q2)."""
    B, S = state.shape
    _, A = action.shape
    (w14s, w14a, b14, w2b, b2, w5b, b5, w36, b36) = packed

    # Batch tiling: largest natural tile that divides B; tiny/odd batches run
    # as a single grid point (block == full array, so no (8,128) constraint).
    tb = B
    for cand in (512, 256, 128):
        if B >= cand and B % cand == 0:
            tb = cand
            break
    grid = (B // tb,)

    row = lambda shape: pl.BlockSpec(shape, lambda i: (i, 0))      # batch-tiled
    rep = lambda shape: pl.BlockSpec(shape, lambda i: (0, 0))      # VMEM-resident

    in_specs = [
        row((tb, S)), row((tb, A)),
        rep((S, 2 * HIDDEN)), rep((A, 2 * HIDDEN)), rep((1, 2 * HIDDEN)),
        rep((HIDDEN, HIDDEN)), rep((1, HIDDEN)),
        rep((HIDDEN, HIDDEN)), rep((1, HIDDEN)),
        rep((2 * HIDDEN, 2)), rep((1, 2)),
    ]
    out_specs = row((tb, 2))

    q12 = pl.pallas_call(
        _critic_kernel,
        out_shape=jax.ShapeDtypeStruct((B, 2), jnp.float32),
        grid=grid,
        in_specs=in_specs,
        out_specs=out_specs,
        compiler_params=pltpu.CompilerParams(
            dimension_semantics=("parallel",)),
    )(state, action, w14s, w14a, b14, w2b, b2, w5b, b5, w36, b36)

    return q12[:, 0:1], q12[:, 1:2]


def init_params(key, state_dim, action_dim):
    """Deterministic init matching PyTorch nn.Linear shapes.

    PyTorch l_k.weight is (out, in); we store the transpose (in, out).
    Uses U(-1/sqrt(fan_in), 1/sqrt(fan_in)) like torch's default init.
    """
    d = state_dim + action_dim
    layer_dims = [(d, HIDDEN), (HIDDEN, HIDDEN), (HIDDEN, 1),
                  (d, HIDDEN), (HIDDEN, HIDDEN), (HIDDEN, 1)]
    params = []
    keys = jax.random.split(key, 2 * len(layer_dims))
    for i, (fan_in, fan_out) in enumerate(layer_dims):
        bound = 1.0 / jnp.sqrt(jnp.float32(fan_in))
        w = jax.random.uniform(keys[2 * i], (fan_in, fan_out),
                               minval=-bound, maxval=bound, dtype=jnp.float32)
        b = jax.random.uniform(keys[2 * i + 1], (1, fan_out),
                               minval=-bound, maxval=bound, dtype=jnp.float32)
        params += [w, b]
    return tuple(params)


def _reference_forward(state, action, params):
    """Plain-JAX f32 reference (mirrors the PyTorch module) for a sanity check."""
    (w1, b1, w2, b2, w3, b3, w4, b4, w5, b5, w6, b6) = params
    sa = jnp.concatenate([state, action], axis=1)
    h1 = jnp.maximum(sa @ w1 + b1, 0.0)
    h1 = jnp.maximum(h1 @ w2 + b2, 0.0)
    q1 = h1 @ w3 + b3
    h2 = jnp.maximum(sa @ w4 + b4, 0.0)
    h2 = jnp.maximum(h2 @ w5 + b5, 0.0)
    q2 = h2 @ w6 + b6
    return q1, q2


if __name__ == "__main__":
    key = jax.random.PRNGKey(0)
    k_s, k_a, k_p = jax.random.split(key, 3)

    batch, state_dim, action_dim = 8, 17, 6
    state = jax.random.normal(k_s, (batch, state_dim), dtype=jnp.float32)
    action = jax.random.normal(k_a, (batch, action_dim), dtype=jnp.float32)
    params = init_params(k_p, state_dim, action_dim)

    packed = pack_params(params, state_dim)          # one-time packing (bf16 weights)
    packed = jax.tree_util.tree_map(jax.block_until_ready, packed)

    q1, q2 = critic_forward(state, action, packed)
    jax.block_until_ready((q1, q2))

    q1_ref, q2_ref = _reference_forward(state, action, params)
    assert q1.shape == (batch, 1) and q2.shape == (batch, 1)
    # bf16 weights/activations in the hidden layers -> slightly loosened tolerance.
    assert jnp.allclose(q1, q1_ref, atol=2e-2, rtol=2e-2)
    assert jnp.allclose(q2, q2_ref, atol=2e-2, rtol=2e-2)

    print("KERNEL_OK")
</pallas_src>

<mosaic_0001>
module attributes {stable_mosaic.version = 11 : i64} {
  func.func @_critic_kernel(%arg0: i32, %arg1: memref<8x17xf32, #tpu.memory_space<vmem>>, %arg2: memref<8x6xf32, #tpu.memory_space<vmem>>, %arg3: memref<17x512xbf16, #tpu.memory_space<vmem>>, %arg4: memref<6x512xbf16, #tpu.memory_space<vmem>>, %arg5: memref<1x512xf32, #tpu.memory_space<vmem>>, %arg6: memref<256x256xbf16, #tpu.memory_space<vmem>>, %arg7: memref<1x256xf32, #tpu.memory_space<vmem>>, %arg8: memref<256x256xbf16, #tpu.memory_space<vmem>>, %arg9: memref<1x256xf32, #tpu.memory_space<vmem>>, %arg10: memref<512x2xf32, #tpu.memory_space<vmem>>, %arg11: memref<1x2xf32, #tpu.memory_space<vmem>>, %arg12: memref<8x2xf32, #tpu.memory_space<vmem>>) attributes {dimension_semantics = [#tpu.dimension_semantics<parallel>], iteration_bounds = array<i64: 1>, scalar_prefetch = 0 : i64, scratch_operands = 0 : i64, tpu.core_type = #tpu.core_type<tc>, window_params = [{transform_indices = @transform_0, window_bounds = array<i64: 8, 17>}, {transform_indices = @transform_1, window_bounds = array<i64: 8, 6>}, {pipeline_mode = #tpu.pipeline_mode<synchronous>, transform_indices = @transform_2, window_bounds = array<i64: 17, 512>}, {pipeline_mode = #tpu.pipeline_mode<synchronous>, transform_indices = @transform_3, window_bounds = array<i64: 6, 512>}, {pipeline_mode = #tpu.pipeline_mode<synchronous>, transform_indices = @transform_4, window_bounds = array<i64: 1, 512>}, {pipeline_mode = #tpu.pipeline_mode<synchronous>, transform_indices = @transform_5, window_bounds = array<i64: 256, 256>}, {pipeline_mode = #tpu.pipeline_mode<synchronous>, transform_indices = @transform_6, window_bounds = array<i64: 1, 256>}, {pipeline_mode = #tpu.pipeline_mode<synchronous>, transform_indices = @transform_7, window_bounds = array<i64: 256, 256>}, {pipeline_mode = #tpu.pipeline_mode<synchronous>, transform_indices = @transform_8, window_bounds = array<i64: 1, 256>}, {pipeline_mode = #tpu.pipeline_mode<synchronous>, transform_indices = @transform_9, window_bounds = array<i64: 512, 2>}, {pipeline_mode = #tpu.pipeline_mode<synchronous>, transform_indices = @transform_10, window_bounds = array<i64: 1, 2>}, {transform_indices = @transform_11, window_bounds = array<i64: 8, 2>}]} {
    %c0 = arith.constant 0 : index
    %c0_0 = arith.constant 0 : index
    %0 = vector.load %arg1[%c0, %c0_0] : memref<8x17xf32, #tpu.memory_space<vmem>>, vector<8x17xf32>
    %1 = arith.truncf %0 : vector<8x17xf32> to vector<8x17xbf16>
    %c0_1 = arith.constant 0 : index
    %c0_2 = arith.constant 0 : index
    %2 = vector.load %arg2[%c0_1, %c0_2] : memref<8x6xf32, #tpu.memory_space<vmem>>, vector<8x6xf32>
    %3 = arith.truncf %2 : vector<8x6xf32> to vector<8x6xbf16>
    %c0_3 = arith.constant 0 : index
    %c0_4 = arith.constant 0 : index
    %4 = vector.load %arg3[%c0_3, %c0_4] : memref<17x512xbf16, #tpu.memory_space<vmem>>, vector<17x512xbf16>
    %cst = arith.constant dense<0.000000e+00> : vector<8x512xf32>
    %5 = tpu.matmul %1, %4, %cst {dimension_numbers = #tpu.dot_dimension_numbers<[1], [0], [0], [1], [0, 0, 1, 1], [], []>} : vector<8x17xbf16>, vector<17x512xbf16>, vector<8x512xf32> -> vector<8x512xf32>
    %c0_5 = arith.constant 0 : index
    %c0_6 = arith.constant 0 : index
    %6 = vector.load %arg4[%c0_5, %c0_6] : memref<6x512xbf16, #tpu.memory_space<vmem>>, vector<6x512xbf16>
    %cst_7 = arith.constant dense<0.000000e+00> : vector<8x512xf32>
    %7 = tpu.matmul %3, %6, %cst_7 {dimension_numbers = #tpu.dot_dimension_numbers<[1], [0], [0], [1], [0, 0, 1, 1], [], []>} : vector<8x6xbf16>, vector<6x512xbf16>, vector<8x512xf32> -> vector<8x512xf32>
    %8 = arith.addf %5, %7 : vector<8x512xf32>
    %c0_8 = arith.constant 0 : index
    %c0_9 = arith.constant 0 : index
    %9 = vector.load %arg5[%c0_8, %c0_9] : memref<1x512xf32, #tpu.memory_space<vmem>>, vector<1x512xf32>
    %10 = vector.broadcast %9 : vector<1x512xf32> to vector<8x512xf32>
    %11 = arith.addf %8, %10 : vector<8x512xf32>
    %cst_10 = arith.constant 0.000000e+00 : f32
    %12 = vector.broadcast %cst_10 : f32 to vector<8x512xf32>
    %13 = arith.maximumf %11, %12 : vector<8x512xf32>
    %14 = vector.extract_strided_slice %13 {offsets = [0, 0], sizes = [8, 256], strides = [1, 1]} : vector<8x512xf32> to vector<8x256xf32>
    %15 = arith.truncf %14 : vector<8x256xf32> to vector<8x256xbf16>
    %16 = vector.extract_strided_slice %13 {offsets = [0, 256], sizes = [8, 256], strides = [1, 1]} : vector<8x512xf32> to vector<8x256xf32>
    %17 = arith.truncf %16 : vector<8x256xf32> to vector<8x256xbf16>
    %c0_11 = arith.constant 0 : index
    %c0_12 = arith.constant 0 : index
    %18 = vector.load %arg6[%c0_11, %c0_12] : memref<256x256xbf16, #tpu.memory_space<vmem>>, vector<256x256xbf16>
    %cst_13 = arith.constant dense<0.000000e+00> : vector<8x256xf32>
    %19 = tpu.matmul %15, %18, %cst_13 {dimension_numbers = #tpu.dot_dimension_numbers<[1], [0], [0], [1], [0, 0, 1, 1], [], []>} : vector<8x256xbf16>, vector<256x256xbf16>, vector<8x256xf32> -> vector<8x256xf32>
    %c0_14 = arith.constant 0 : index
    %c0_15 = arith.constant 0 : index
    %20 = vector.load %arg7[%c0_14, %c0_15] : memref<1x256xf32, #tpu.memory_space<vmem>>, vector<1x256xf32>
    %21 = vector.broadcast %20 : vector<1x256xf32> to vector<8x256xf32>
    %22 = arith.addf %19, %21 : vector<8x256xf32>
    %cst_16 = arith.constant 0.000000e+00 : f32
    %23 = vector.broadcast %cst_16 : f32 to vector<8x256xf32>
    %24 = arith.maximumf %22, %23 : vector<8x256xf32>
    %c0_17 = arith.constant 0 : index
    %c0_18 = arith.constant 0 : index
    %25 = vector.load %arg8[%c0_17, %c0_18] : memref<256x256xbf16, #tpu.memory_space<vmem>>, vector<256x256xbf16>
    %cst_19 = arith.constant dense<0.000000e+00> : vector<8x256xf32>
    %26 = tpu.matmul %17, %25, %cst_19 {dimension_numbers = #tpu.dot_dimension_numbers<[1], [0], [0], [1], [0, 0, 1, 1], [], []>} : vector<8x256xbf16>, vector<256x256xbf16>, vector<8x256xf32> -> vector<8x256xf32>
    %c0_20 = arith.constant 0 : index
    %c0_21 = arith.constant 0 : index
    %27 = vector.load %arg9[%c0_20, %c0_21] : memref<1x256xf32, #tpu.memory_space<vmem>>, vector<1x256xf32>
    %28 = vector.broadcast %27 : vector<1x256xf32> to vector<8x256xf32>
    %29 = arith.addf %26, %28 : vector<8x256xf32>
    %cst_22 = arith.constant 0.000000e+00 : f32
    %30 = vector.broadcast %cst_22 : f32 to vector<8x256xf32>
    %31 = arith.maximumf %29, %30 : vector<8x256xf32>
    %32 = tpu.concatenate %24, %31 in 1 : vector<8x256xf32>, vector<8x256xf32> -> vector<8x512xf32>
    %c0_23 = arith.constant 0 : index
    %c0_24 = arith.constant 0 : index
    %33 = vector.load %arg10[%c0_23, %c0_24] : memref<512x2xf32, #tpu.memory_space<vmem>>, vector<512x2xf32>
    %cst_25 = arith.constant dense<0.000000e+00> : vector<8x2xf32>
    %34 = tpu.matmul %32, %33, %cst_25 {dimension_numbers = #tpu.dot_dimension_numbers<[1], [0], [0], [1], [0, 0, 1, 1], [], []>} : vector<8x512xf32>, vector<512x2xf32>, vector<8x2xf32> -> vector<8x2xf32>
    %c0_26 = arith.constant 0 : index
    %c0_27 = arith.constant 0 : index
    %35 = vector.load %arg11[%c0_26, %c0_27] : memref<1x2xf32, #tpu.memory_space<vmem>>, vector<1x2xf32>
    %36 = vector.broadcast %35 : vector<1x2xf32> to vector<8x2xf32>
    %37 = arith.addf %34, %36 : vector<8x2xf32>
    %c0_28 = arith.constant 0 : index
    %c0_29 = arith.constant 0 : index
    %38 = vector.load %arg12[%c0_28, %c0_29] : memref<8x2xf32, #tpu.memory_space<vmem>>, vector<8x2xf32>
    tpu.vector_store %arg12[%c0_28, %c0_29], %37 {strides = array<i32>} : memref<8x2xf32, #tpu.memory_space<vmem>>, vector<8x2xf32>,
    return
  }
  func.func @transform_0(%arg0: i32) -> (i32, i32) {
    %c0_i32 = arith.constant 0 : i32
    %c0_i32_0 = arith.constant 0 : i32
    return %arg0, %c0_i32 : i32, i32
  }
  func.func @transform_1(%arg0: i32) -> (i32, i32) {
    %c0_i32 = arith.constant 0 : i32
    %c0_i32_0 = arith.constant 0 : i32
    return %arg0, %c0_i32 : i32, i32
  }
  func.func @transform_2(%arg0: i32) -> (i32, i32) {
    %c0_i32 = arith.constant 0 : i32
    %c0_i32_0 = arith.constant 0 : i32
    %c0_i32_1 = arith.constant 0 : i32
    return %c0_i32, %c0_i32_0 : i32, i32
  }
  func.func @transform_3(%arg0: i32) -> (i32, i32) {
    %c0_i32 = arith.constant 0 : i32
    %c0_i32_0 = arith.constant 0 : i32
    %c0_i32_1 = arith.constant 0 : i32
    return %c0_i32, %c0_i32_0 : i32, i32
  }
  func.func @transform_4(%arg0: i32) -> (i32, i32) {
    %c0_i32 = arith.constant 0 : i32
    %c0_i32_0 = arith.constant 0 : i32
    %c0_i32_1 = arith.constant 0 : i32
    return %c0_i32, %c0_i32_0 : i32, i32
  }
  func.func @transform_5(%arg0: i32) -> (i32, i32) {
    %c0_i32 = arith.constant 0 : i32
    %c0_i32_0 = arith.constant 0 : i32
    %c0_i32_1 = arith.constant 0 : i32
    return %c0_i32, %c0_i32_0 : i32, i32
  }
  func.func @transform_6(%arg0: i32) -> (i32, i32) {
    %c0_i32 = arith.constant 0 : i32
    %c0_i32_0 = arith.constant 0 : i32
    %c0_i32_1 = arith.constant 0 : i32
    return %c0_i32, %c0_i32_0 : i32, i32
  }
  func.func @transform_7(%arg0: i32) -> (i32, i32) {
    %c0_i32 = arith.constant 0 : i32
    %c0_i32_0 = arith.constant 0 : i32
    %c0_i32_1 = arith.constant 0 : i32
    return %c0_i32, %c0_i32_0 : i32, i32
  }
  func.func @transform_8(%arg0: i32) -> (i32, i32) {
    %c0_i32 = arith.constant 0 : i32
    %c0_i32_0 = arith.constant 0 : i32
    %c0_i32_1 = arith.constant 0 : i32
    return %c0_i32, %c0_i32_0 : i32, i32
  }
  func.func @transform_9(%arg0: i32) -> (i32, i32) {
    %c0_i32 = arith.constant 0 : i32
    %c0_i32_0 = arith.constant 0 : i32
    %c0_i32_1 = arith.constant 0 : i32
    return %c0_i32, %c0_i32_0 : i32, i32
  }
  func.func @transform_10(%arg0: i32) -> (i32, i32) {
    %c0_i32 = arith.constant 0 : i32
    %c0_i32_0 = arith.constant 0 : i32
    %c0_i32_1 = arith.constant 0 : i32
    return %c0_i32, %c0_i32_0 : i32, i32
  }
  func.func @transform_11(%arg0: i32) -> (i32, i32) {
    %c0_i32 = arith.constant 0 : i32
    %c0_i32_0 = arith.constant 0 : i32
    return %arg0, %c0_i32 : i32, i32
  }
}

</mosaic_0001>

<bundles_post_ra>
// kernel: critic_forward.1
= control target key start
LH: loop header
LB: loop body
LE: loop exit
PB: predicated region body
PF: predicated region fallthrough
CT: control target
= control target key end

     0   :  { %16 = vsyncpa [#allocation3], 0  ;;  %s1994_s0 = inlined_call_operand.vmem [shape: f32[8,17], index: 0, kind: input, shape index: {}]   ;;  %s1995_s1 = inlined_call_operand.hbm [shape: f32[8,6], index: 1, kind: input, shape index: {}]   ;;  %s1996_s2 = inlined_call_operand.hbm [shape: bf16[17,512], index: 2, kind: input, shape index: {}]   ;;  %s1997_s3 = inlined_call_operand.hbm [shape: bf16[6,512], index: 3, kind: input, shape index: {}]   ;;  %s1998_s4 = inlined_call_operand.vmem [shape: f32[1,512], index: 4, kind: input, shape index: {}]   ;;  %s1999_s5 = inlined_call_operand.vmem [shape: bf16[256,256], index: 5, kind: input, shape index: {}]   ;;  %s2000_s6 = inlined_call_operand.vmem [shape: f32[1,256], index: 6, kind: input, shape index: {}]   ;;  %s2001_s7 = inlined_call_operand.vmem [shape: bf16[256,256], index: 7, kind: input, shape index: {}]   ;;  %s2002_s8 = inlined_call_operand.vmem [shape: f32[1,256], index: 8, kind: input, shape index: {}]   ;;  %s2003_s9 = inlined_call_operand.vmem [shape: f32[512,2], index: 9, kind: input, shape index: {}]   ;;  %s2004_s10 = inlined_call_operand.vmem [shape: f32[1,2], index: 10, kind: input, shape index: {}]   ;;  %s2005_s11 = inlined_call_operand.vmem [shape: f32[8,2], index: 11, kind: output, shape index: {}]  }
   0x1   :  { %17 = vsyncpa [#allocation5], 0  ;;  %s1478_s17 = smov [#allocation4]   ;;  %s1408_s21 = scalar_lea.hbm %s1996_s2, 768 }
   0x2   :  { %s35_s18 = sshll.u32 %s1478_s17, 4  ;;  %p1409_p0 = scmp.ne.s32.totalorder %s1996_s2, %s1408_s21  ;;  %s36_s18 = int_to_ptr.vmem [resolvable:$true] %s35_s18 }
   0x3   :  { %p1412_p1 = scmp.lt.u32.totalorder %s1408_s21, %s1996_s2 }
   0x5   :  { %p1414_p2 = pnand %p1412_p1, %p1409_p0 }
   0x7   :  { %1417 = shalt.err (!%p1414_p2)
}
   0x8   :  { %s1418_s26 = scalar_lea.vmem %s36_s18, 768  ;;  %p1423_p4 = scmp.lt.s32.totalorder %s36_s18, %s36_s18 }
   0x9   :  { %p1419_p3 = scmp.ne.s32.totalorder %s36_s18, %s1418_s26  ;;  %p1424_p5 = scmp.lt.s32.totalorder %s1418_s26, %s1418_s26 }
   0xb   :  { %p1425_p6 = por %p1424_p5, %p1423_p4 }
   0xd   :  { %p1426_p7 = pnand %p1425_p6, %p1419_p3 }
   0xf   :  { %1429 = shalt.err (!%p1426_p7)
}
  0x10   :  { %s1479_s27 = smov 256   ;;  %s1480_s28 = smov 16  }
  0x11   :  { %41 = dma.hbm_to_vmem [thread:$0]  %s1996_s2, 768, %s36_s18, [#allocation5], %s1479_s27, %s1479_s27, %s1480_s28  }
  0x12   :  { %s1481_s12 = smov [#allocation2]   ;;  %s1482_s14 = smov [#allocation6]  }
  0x13   :  { %s26_s13 = sshll.u32 %s1481_s12, 4  ;;  %s48_s15 = sshll.u32 %s1482_s14, 4  ;;  %s27_s13 = int_to_ptr.vmem [resolvable:$true] %s26_s13  ;;  %s49_s15 = int_to_ptr.vmem [resolvable:$true] %s48_s15 }
  0x14   :  { %s1430_s19 = scalar_lea.hbm %s1995_s1, 128 }
  0x15   :  { %p1431_p8 = scmp.ne.s32.totalorder %s1995_s1, %s1430_s19  ;;  %p1434_p9 = scmp.lt.u32.totalorder %s1430_s19, %s1995_s1 }
  0x17   :  { %p1436_p10 = pnand %p1434_p9, %p1431_p8 }
  0x19   :  { %1439 = shalt.err (!%p1436_p10)
}
  0x1a   :  { %s1440_s2 = scalar_lea.vmem %s27_s13, 128  ;;  %p1445_p12 = scmp.lt.s32.totalorder %s27_s13, %s27_s13 }
  0x1b   :  { %p1441_p11 = scmp.ne.s32.totalorder %s27_s13, %s1440_s2  ;;  %p1446_p13 = scmp.lt.s32.totalorder %s1440_s2, %s1440_s2 }
  0x1d   :  { %p1447_p0 = por %p1446_p13, %p1445_p12 }
  0x1f   :  { %p1448_p1 = pnand %p1447_p0, %p1441_p11 }
  0x21   :  { %1451 = shalt.err (!%p1448_p1)
}
  0x22   :  { %29 = dma.hbm_to_vmem [thread:$0]  %s1995_s1, 128, %s27_s13, [#allocation3]  }
  0x23   :  { %s1452_s27 = scalar_lea.hbm %s1997_s3, 256 }
  0x24   :  { %p1453_p2 = scmp.ne.s32.totalorder %s1997_s3, %s1452_s27  ;;  %p1456_p3 = scmp.lt.u32.totalorder %s1452_s27, %s1997_s3 }
  0x26   :  { %p1458_p4 = pnand %p1456_p3, %p1453_p2 }
  0x28   :  { %1461 = shalt.err (!%p1458_p4)
}
  0x29   :  { %s1462_s14 = scalar_lea.vmem %s49_s15, 256  ;;  %p1467_p6 = scmp.lt.s32.totalorder %s49_s15, %s49_s15 }
  0x2a   :  { %p1463_p5 = scmp.ne.s32.totalorder %s49_s15, %s1462_s14  ;;  %p1468_p7 = scmp.lt.s32.totalorder %s1462_s14, %s1462_s14 }
  0x2c   :  { %p1469_p8 = por %p1468_p7, %p1467_p6 }
  0x2e   :  { %p1470_p9 = pnand %p1469_p8, %p1463_p5 }
  0x30   :  { %1473 = shalt.err (!%p1470_p9)
}
  0x31   :  { %51 = dma.hbm_to_vmem [thread:$0]  %s1997_s3, 256, %s49_s15, [#allocation5]  }
  0x32   :  { %1474 = dma.done.wait [#allocation3], 128  }
  0x33   :  { %1475 = vsyncadd [#allocation3], 4294967168 }
  0x34   :  { %1476 = dma.done.wait [#allocation5], 1024  }
  0x35   :  { %1477 = vsyncadd [#allocation5], 4294966272  ;;  %v1483_v0 = vmov 0   ;;  %vm231_vm0 = vcmask 1040384   ;;  %v86_v1 = vld [vmem:[#allocation6] sm:$0x77] }
  0x36   :  { %147 = vmatprep.mubr.bf16.mxu0 %v1483_v0  ;;  %188 = vmatprep.mubr.bf16.mxu1 %v1483_v0  ;;  %vm102_vm1 = vcmask 1042432   ;;  %v87_v2 = vld [vmem:[#allocation6 + $0x8] sm:$0x77]  ;;  %v1076_v4 = vcombine.high %v86_v1, %v86_v1  ;;  %v1075_v6 = vcombine.low %v86_v1, %v86_v1  ;;  %vm98_vm2 = vcmask 48128   ;;  %v1304_v8 = vld [vmem:[#allocation4 + $0x4] ss:$16 sps:$4 sm:$0xff]  }
  0x37   :  { %v78_v3 = vld [vmem:[#allocation2] sm:$0xff]  ;;  %v1078_v5 = vcombine.high %v87_v2, %v87_v2  ;;  %v1077_v7 = vcombine.low %v87_v2, %v87_v2  ;;  %v233_v9 = vsel %vm231_vm0, 65535, %v1483_v0  ;;  %v1302_v13 = vld [vmem:[#allocation4] ss:$16 sps:$4 sm:$0xff]   ;;  %v85_v17 = vld [vmem:[#allocation4 + $0x28] sm:$0x11] }
  0x38   :  { %1079 = vmatprep.subr.msk.bf16.mxu0 %vm102_vm1, %v1076_v4  ;;  %v104_v10 = vsel %vm102_vm1, %v1075_v6, 0  ;;  %v79_v12 = vpack.c.bf16 %v78_v3, %v78_v3  ;;  %v1307_v14 = vld [vmem:[#allocation4 + $0xc] ss:$16 sps:$4 sm:$0xff]   ;;  %v1305_v15 = vld [vmem:[#allocation4 + $0x8] ss:$16 sps:$4 sm:$0xff]   ;;  %v1089_v20 = vcombine.low %v85_v17, %v85_v17  ;;  %v1090_v21 = vcombine.high %v85_v17, %v85_v17 }
  0x39   :  { %1081 = vmatprep.subr.msk.bf16.mxu1 %vm102_vm1, %v1078_v5  ;;  %v110_v11 = vsel %vm102_vm1, %v1077_v7, 0  ;;  %116 = vmatpush1.bf16.msra.mxu0 %v104_v10  ;;  %v84_v16 = vld [vmem:[#allocation4 + $0x20] sm:$0x11]  ;;  %v76_v26 = vld [vmem:[%s1994_s0] sm:$0xff]  ;;  %vm227_vm3 = vcmask 138240   ;;  %vm1067_vm4 = vcmask 15360  }
  0x3a   :  { %157 = vmatpush1.bf16.msra.mxu1 %v110_v11  ;;  %246 = vmatprep.subr.bf16.mxu0 %v1304_v8  ;;  %v1087_v18 = vcombine.low %v84_v16, %v84_v16  ;;  %v1088_v19 = vcombine.high %v84_v16, %v84_v16  ;;  %v244_v23 = vand.u32 %v1090_v21, %v233_v9  ;;  %v1314_v27 = vld [vmem:[%s1999_s5 + $0x4] ss:$8 sps:$4 sm:$0xff]   ;;  %v1312_v30 = vld [vmem:[%s1999_s5] ss:$8 sps:$4 sm:$0xff]   ;;  %v1320_v32 = vld [vmem:[%s1999_s5 + $0x14] ss:$8 sps:$4 sm:$0xff]  }
  0x3b   :  { %287 = vmatprep.subr.bf16.mxu1 %v1307_v14  ;;  %v241_v25 = vand.u32 %v1089_v20, %v233_v9  ;;  %v1317_v28 = vld [vmem:[%s2001_s7 + $0x4] ss:$8 sps:$4 sm:$0xff]   ;;  %v77_v29 = vpack.c.bf16 %v76_v26, %v76_v26  ;;  %v1315_v31 = vld [vmem:[%s2001_s7] ss:$8 sps:$4 sm:$0xff]   ;;  %v1323_v33 = vld [vmem:[%s2001_s7 + $0x14] ss:$8 sps:$4 sm:$0xff]  }
  0x3c   :  { %1080 = vmatmul.mubr.msk.bf16.vlgmr.msra.gmra.mrb[0].mxu0 %vm98_vm2, %v79_v12  ;;  %v238_v22 = vand.u32 %v1088_v19, %v233_v9  ;;  %v235_v24 = vand.u32 %v1087_v18, %v233_v9  ;;  %v1318_v34 = vld [vmem:[%s1999_s5 + $0x10] ss:$8 sps:$4 sm:$0xff]   ;;  %v1326_v36 = vld [vmem:[%s1999_s5 + $0x24] ss:$8 sps:$4 sm:$0xff]   ;;  %v1324_v38 = vld [vmem:[%s1999_s5 + $0x20] ss:$8 sps:$4 sm:$0xff]  }
  0x3d   :  { %1082 = vmatmul.mubr.msk.bf16.vlgmr.msra.gmra.mrb[0].mxu1 %vm98_vm2, %v79_v12  ;;  %247 = vmatpush1.bf16.msra.mxu0 %v1302_v13  ;;  %v1321_v35 = vld [vmem:[%s2001_s7 + $0x10] ss:$8 sps:$4 sm:$0xff]   ;;  %v1329_v37 = vld [vmem:[%s2001_s7 + $0x24] ss:$8 sps:$4 sm:$0xff]   ;;  %v1327_v39 = vld [vmem:[%s2001_s7 + $0x20] ss:$8 sps:$4 sm:$0xff]  }
  0x3e   :  { %288 = vmatpush1.bf16.msra.mxu1 %v1305_v15  ;;  %248 = vmatprep.subr.bf16.mxu0 %v238_v22  ;;  %v1332_v40 = vld [vmem:[%s1999_s5 + $0x34] ss:$8 sps:$4 sm:$0xff]   ;;  %v1330_v42 = vld [vmem:[%s1999_s5 + $0x30] ss:$8 sps:$4 sm:$0xff]   ;;  %v1338_v44 = vld [vmem:[%s1999_s5 + $0x44] ss:$8 sps:$4 sm:$0xff]  }
  0x3f   :  { %278 = vmatprep.mubr.bf16.mxu0 %v1483_v0  ;;  %289 = vmatprep.subr.bf16.mxu1 %v244_v23  ;;  %v1335_v41 = vld [vmem:[%s2001_s7 + $0x34] ss:$8 sps:$4 sm:$0xff]   ;;  %v1333_v43 = vld [vmem:[%s2001_s7 + $0x30] ss:$8 sps:$4 sm:$0xff]   ;;  %v1341_v45 = vld [vmem:[%s2001_s7 + $0x44] ss:$8 sps:$4 sm:$0xff]  }
  0x40   :  { %319 = vmatprep.mubr.bf16.mxu1 %v1483_v0  ;;  %v1336_v46 = vld [vmem:[%s1999_s5 + $0x40] ss:$8 sps:$4 sm:$0xff]   ;;  %v1344_v48 = vld [vmem:[%s1999_s5 + $0x54] ss:$8 sps:$4 sm:$0xff]   ;;  %v1342_v50 = vld [vmem:[%s1999_s5 + $0x50] ss:$8 sps:$4 sm:$0xff]  }
  0x41   :  { %249 = vmatpush1.bf16.msra.mxu0 %v235_v24  ;;  %v1339_v47 = vld [vmem:[%s2001_s7 + $0x40] ss:$8 sps:$4 sm:$0xff]   ;;  %v1347_v49 = vld [vmem:[%s2001_s7 + $0x54] ss:$8 sps:$4 sm:$0xff]   ;;  %v1345_v51 = vld [vmem:[%s2001_s7 + $0x50] ss:$8 sps:$4 sm:$0xff]  }
  0x42   :  { %290 = vmatpush1.bf16.msra.mxu1 %v241_v25  ;;  %566 = vmatprep.subr.bf16.mxu0 %v1314_v27  ;;  %v1350_v52 = vld [vmem:[%s1999_s5 + $0x64] ss:$8 sps:$4 sm:$0xff]   ;;  %v1348_v54 = vld [vmem:[%s1999_s5 + $0x60] ss:$8 sps:$4 sm:$0xff]   ;;  %v1356_v56 = vld [vmem:[%s1999_s5 + $0x74] ss:$8 sps:$4 sm:$0xff]  }
  0x43   :  { %813 = vmatprep.subr.bf16.mxu1 %v1317_v28  ;;  %v1353_v53 = vld [vmem:[%s2001_s7 + $0x64] ss:$8 sps:$4 sm:$0xff]   ;;  %v1351_v55 = vld [vmem:[%s2001_s7 + $0x60] ss:$8 sps:$4 sm:$0xff]   ;;  %v1359_v57 = vld [vmem:[%s2001_s7 + $0x74] ss:$8 sps:$4 sm:$0xff]  }
  0x44   :  { %1091 = vmatmul.mubr.msk.bf16.vlgmr.msra.gmra.mrb[4].mxu0 %vm227_vm3, %v77_v29  ;;  %v1354_v58 = vld [vmem:[%s1999_s5 + $0x70] ss:$8 sps:$4 sm:$0xff]   ;;  %v1362_v60 = vld [vmem:[%s1999_s5 + $0x84] ss:$8 sps:$4 sm:$0xff]   ;;  %v1360_v62 = vld [vmem:[%s1999_s5 + $0x80] ss:$8 sps:$4 sm:$0xff]  }
  0x45   :  { %1092 = vmatmul.mubr.msk.bf16.vlgmr.msra.gmra.mrb[4].mxu1 %vm227_vm3, %v77_v29  ;;  %567 = vmatpush1.bf16.msra.mxu0 %v1312_v30  ;;  %v1357_v59 = vld [vmem:[%s2001_s7 + $0x70] ss:$8 sps:$4 sm:$0xff]   ;;  %v1365_v61 = vld [vmem:[%s2001_s7 + $0x84] ss:$8 sps:$4 sm:$0xff]   ;;  %v1363_v63 = vld [vmem:[%s2001_s7 + $0x80] ss:$8 sps:$4 sm:$0xff]  }
  0x46   :  { %814 = vmatpush1.bf16.msra.mxu1 %v1315_v31  ;;  %568 = vmatprep.subr.bf16.mxu0 %v1320_v32  ;;  %v1368_v0 = vld [vmem:[%s1999_s5 + $0x94] ss:$8 sps:$4 sm:$0xff]   ;;  %v1366_v2 = vld [vmem:[%s1999_s5 + $0x90] ss:$8 sps:$4 sm:$0xff]   ;;  %v1374_v4 = vld [vmem:[%s1999_s5 + $0xa4] ss:$8 sps:$4 sm:$0xff]  }
  0x47   :  { %815 = vmatprep.subr.bf16.mxu1 %v1323_v33  ;;  %v1371_v1 = vld [vmem:[%s2001_s7 + $0x94] ss:$8 sps:$4 sm:$0xff]   ;;  %v1369_v3 = vld [vmem:[%s2001_s7 + $0x90] ss:$8 sps:$4 sm:$0xff]   ;;  %v1377_v5 = vld [vmem:[%s2001_s7 + $0xa4] ss:$8 sps:$4 sm:$0xff]  }
  0x48   :  { %v1372_v6 = vld [vmem:[%s1999_s5 + $0xa0] ss:$8 sps:$4 sm:$0xff]   ;;  %v1380_v8 = vld [vmem:[%s1999_s5 + $0xb4] ss:$8 sps:$4 sm:$0xff]   ;;  %v1378_v10 = vld [vmem:[%s1999_s5 + $0xb0] ss:$8 sps:$4 sm:$0xff]  }
  0x49   :  { %569 = vmatpush1.bf16.msra.mxu0 %v1318_v34  ;;  %v1375_v7 = vld [vmem:[%s2001_s7 + $0xa0] ss:$8 sps:$4 sm:$0xff]   ;;  %v1383_v9 = vld [vmem:[%s2001_s7 + $0xb4] ss:$8 sps:$4 sm:$0xff]   ;;  %v1381_v11 = vld [vmem:[%s2001_s7 + $0xb0] ss:$8 sps:$4 sm:$0xff]   ;;  %v330_v34 = vlaneseq }
  0x4a   :  { %816 = vmatpush1.bf16.msra.mxu1 %v1321_v35  ;;  %570 = vmatprep.subr.bf16.mxu0 %v1326_v36  ;;  %v1386_v12 = vld [vmem:[%s1999_s5 + $0xc4] ss:$8 sps:$4 sm:$0xff]   ;;  %v1384_v14 = vld [vmem:[%s1999_s5 + $0xc0] ss:$8 sps:$4 sm:$0xff]   ;;  %v1392_v16 = vld [vmem:[%s1999_s5 + $0xd4] ss:$8 sps:$4 sm:$0xff]  }
  0x4b   :  { %817 = vmatprep.subr.bf16.mxu1 %v1329_v37  ;;  %v1389_v13 = vld [vmem:[%s2001_s7 + $0xc4] ss:$8 sps:$4 sm:$0xff]   ;;  %v1387_v15 = vld [vmem:[%s2001_s7 + $0xc0] ss:$8 sps:$4 sm:$0xff]   ;;  %v1390_v17 = vld [vmem:[%s1999_s5 + $0xd0] ss:$8 sps:$4 sm:$0xff]  }
  0x4c   :  { %v1393_v18 = vld [vmem:[%s2001_s7 + $0xd0] ss:$8 sps:$4 sm:$0xff]   ;;  %v1395_v19 = vld [vmem:[%s2001_s7 + $0xd4] ss:$8 sps:$4 sm:$0xff]   ;;  %v1398_v20 = vld [vmem:[%s1999_s5 + $0xe4] ss:$8 sps:$4 sm:$0xff]  }
  0x4d   :  { %571 = vmatpush1.bf16.msra.mxu0 %v1324_v38  ;;  %v1401_v21 = vld [vmem:[%s2001_s7 + $0xe4] ss:$8 sps:$4 sm:$0xff]   ;;  %v1396_v22 = vld [vmem:[%s1999_s5 + $0xe0] ss:$8 sps:$4 sm:$0xff]   ;;  %v1404_v24 = vld [vmem:[%s1999_s5 + $0xf4] ss:$8 sps:$4 sm:$0xff]  }
  0x4e   :  { %818 = vmatpush1.bf16.msra.mxu1 %v1327_v39  ;;  %572 = vmatprep.subr.bf16.mxu0 %v1332_v40  ;;  %v1399_v23 = vld [vmem:[%s2001_s7 + $0xe0] ss:$8 sps:$4 sm:$0xff]   ;;  %v1407_v25 = vld [vmem:[%s2001_s7 + $0xf4] ss:$8 sps:$4 sm:$0xff]   ;;  %v1402_v26 = vld [vmem:[%s1999_s5 + $0xf0] ss:$8 sps:$4 sm:$0xff]  }
  0x4f   :  { %819 = vmatprep.subr.bf16.mxu1 %v1335_v41  ;;  %v1405_v27 = vld [vmem:[%s2001_s7 + $0xf0] ss:$8 sps:$4 sm:$0xff]   ;;  %v872_v28 = vld [vmem:[%s2003_s9 + $0x80] sm:$0xff]  ;;  %v873_v29 = vld [vmem:[%s2003_s9 + $0x88] sm:$0xff]  ;;  %v331_v35 = vshrl.u32 %v330_v34, 7 }
  0x50   :  { %v904_v30 = vld [vmem:[%s2003_s9 + $0x180] sm:$0xff]  ;;  %v1228_v31 = vpack.c.bf16 %v873_v29, %v872_v28  ;;  %v905_v32 = vld [vmem:[%s2003_s9 + $0x188] sm:$0xff]  ;;  %v891_v28 = vld [vmem:[%s2003_s9 + $0x118] sm:$0xff] }
  0x51   :  { %573 = vmatpush1.bf16.msra.mxu0 %v1330_v42  ;;  %v1260_v33 = vpack.c.bf16 %v905_v32, %v904_v30  ;;  %v876_v29 = vld [vmem:[%s2003_s9 + $0xa0] sm:$0xff]  ;;  %v877_v30 = vld [vmem:[%s2003_s9 + $0xa8] sm:$0xff] }
  0x52   :  { %820 = vmatpush1.bf16.msra.mxu1 %v1333_v43  ;;  %574 = vmatprep.subr.bf16.mxu0 %v1338_v44  ;;  %v1789_v44 = vsub.s32 0, %v331_v35  ;;  %v909_v32 = vld [vmem:[%s2003_s9 + $0x1a8] sm:$0xff] }
  0x53   :  { %821 = vmatprep.subr.bf16.mxu1 %v1341_v45  ;;  %v340_v45 = vsub.s32 2, %v331_v35 }
  0x55   :  { %575 = vmatpush1.bf16.msra.mxu0 %v1336_v46  ;;  %v328_v46 = vld [vmem:[%s1998_s4] sm:$0xf] }
  0x56   :  { %822 = vmatpush1.bf16.msra.mxu1 %v1339_v47  ;;  %576 = vmatprep.subr.bf16.mxu0 %v1344_v48  ;;  %v1794_v47 = vsub.s32 1, %v331_v35  ;;  %v344_v48 = vsub.s32 3, %v331_v35  ;;  %v860_v35 = vld [vmem:[%s2003_s9 + $0x20] sm:$0xff] }
  0x57   :  { %823 = vmatprep.subr.bf16.mxu1 %v1347_v49  ;;  %v333_v49 = vrot.slane %v328_v46, %v1789_v44 }
  0x59   :  { %577 = vmatpush1.bf16.msra.mxu0 %v1342_v50  ;;  %v341_v50 = vrot.slane %v328_v46, %v340_v45  ;;  %v911_v45 = vld [vmem:[%s2003_s9 + $0x1b8] sm:$0xff] }
  0x5a   :  { %824 = vmatpush1.bf16.msra.mxu1 %v1345_v51  ;;  %578 = vmatprep.subr.bf16.mxu0 %v1350_v52 }
  0x5b   :  { %825 = vmatprep.subr.bf16.mxu1 %v1353_v53  ;;  %v337_v53 = vrot.slane %v328_v46, %v1794_v47 }
  0x5d   :  { %579 = vmatpush1.bf16.msra.mxu0 %v1348_v54  ;;  %v345_v54 = vrot.slane %v328_v46, %v344_v48 }
  0x5e   :  { %826 = vmatpush1.bf16.msra.mxu1 %v1351_v55  ;;  %580 = vmatprep.subr.bf16.mxu0 %v1356_v56 }
  0x5f   :  { %827 = vmatprep.subr.bf16.mxu1 %v1359_v57 }
  0x61   :  { %581 = vmatpush1.bf16.msra.mxu0 %v1354_v58 }
  0x62   :  { %828 = vmatpush1.bf16.msra.mxu1 %v1357_v59  ;;  %582 = vmatprep.subr.bf16.mxu0 %v1362_v60 }
  0x63   :  { %829 = vmatprep.subr.bf16.mxu1 %v1365_v61 }
  0x65   :  { %583 = vmatpush1.bf16.msra.mxu0 %v1360_v62 }
  0x66   :  { %830 = vmatpush1.bf16.msra.mxu1 %v1363_v63  ;;  %584 = vmatprep.subr.bf16.mxu0 %v1368_v0 }
  0x67   :  { %831 = vmatprep.subr.bf16.mxu1 %v1371_v1 }
  0x69   :  { %585 = vmatpush1.bf16.msra.mxu0 %v1366_v2 }
  0x6a   :  { %832 = vmatpush1.bf16.msra.mxu1 %v1369_v3  ;;  %586 = vmatprep.subr.bf16.mxu0 %v1374_v4 }
  0x6b   :  { %833 = vmatprep.subr.bf16.mxu1 %v1377_v5  ;;  %v856_v5 = vld [vmem:[%s2003_s9] sm:$0xff] }
  0x6d   :  { %587 = vmatpush1.bf16.msra.mxu0 %v1372_v6  ;;  %v857_v6 = vld [vmem:[%s2003_s9 + $0x8] sm:$0xff] }
  0x6e   :  { %834 = vmatpush1.bf16.msra.mxu1 %v1375_v7  ;;  %588 = vmatprep.subr.bf16.mxu0 %v1380_v8 }
  0x6f   :  { %835 = vmatprep.subr.bf16.mxu1 %v1383_v9  ;;  %v888_v9 = vld [vmem:[%s2003_s9 + $0x100] sm:$0xff] }
  0x71   :  { %589 = vmatpush1.bf16.msra.mxu0 %v1378_v10  ;;  %v889_v10 = vld [vmem:[%s2003_s9 + $0x108] sm:$0xff] }
  0x72   :  { %836 = vmatpush1.bf16.msra.mxu1 %v1381_v11  ;;  %590 = vmatprep.subr.bf16.mxu0 %v1386_v12  ;;  %v874_v11 = vld [vmem:[%s2003_s9 + $0x90] sm:$0xff] }
  0x73   :  { %837 = vmatprep.subr.bf16.mxu1 %v1389_v13 }
  0x75   :  { %591 = vmatpush1.bf16.msra.mxu0 %v1384_v14  ;;  %v875_v14 = vld [vmem:[%s2003_s9 + $0x98] sm:$0xff] }
  0x76   :  { %838 = vmatpush1.bf16.msra.mxu1 %v1387_v15  ;;  %592 = vmatprep.subr.bf16.mxu0 %v1392_v16  ;;  %v906_v15 = vld [vmem:[%s2003_s9 + $0x190] sm:$0xff]  ;;  %v907_v16 = vld [vmem:[%s2003_s9 + $0x198] sm:$0xff] }
  0x77   :  { %839 = vmatprep.subr.bf16.mxu1 %v1395_v19  ;;  %v1230_v19 = vpack.c.bf16 %v857_v6, %v856_v5  ;;  %v914_v5 = vld [vmem:[%s2003_s9 + $0x1d0] sm:$0xff]  ;;  %v915_v6 = vld [vmem:[%s2003_s9 + $0x1d8] sm:$0xff] }
  0x79   :  { %593 = vmatpush1.bf16.msra.mxu0 %v1390_v17 }
  0x7a   :  { %840 = vmatpush1.bf16.msra.mxu1 %v1393_v18  ;;  %594 = vmatprep.subr.bf16.mxu0 %v1398_v20  ;;  %v1262_v20 = vpack.c.bf16 %v889_v10, %v888_v9  ;;  %v866_v9 = vld [vmem:[%s2003_s9 + $0x50] sm:$0xff]  ;;  %v867_v10 = vld [vmem:[%s2003_s9 + $0x58] sm:$0xff] }
  0x7b   :  { %841 = vmatprep.subr.bf16.mxu1 %v1401_v21  ;;  %v858_v21 = vld [vmem:[%s2003_s9 + $0x10] sm:$0xff] }
  0x7d   :  { %595 = vmatpush1.bf16.msra.mxu0 %v1396_v22  ;;  %v859_v22 = vld [vmem:[%s2003_s9 + $0x18] sm:$0xff] }
  0x7e   :  { %842 = vmatpush1.bf16.msra.mxu1 %v1399_v23  ;;  %596 = vmatprep.subr.bf16.mxu0 %v1404_v24 }
  0x7f   :  { %843 = vmatprep.subr.bf16.mxu1 %v1407_v25  ;;  %v1232_v25 = vpack.c.bf16 %v875_v14, %v874_v11  ;;  %v899_v14 = vld [vmem:[%s2003_s9 + $0x158] sm:$0xff] }
  0x81   :  { %597 = vmatpush1.bf16.msra.mxu0 %v1402_v26  ;;  %v1264_v26 = vpack.c.bf16 %v907_v16, %v906_v15  ;;  %v884_v15 = vld [vmem:[%s2003_s9 + $0xe0] sm:$0xff]  ;;  %v885_v16 = vld [vmem:[%s2003_s9 + $0xe8] sm:$0xff] }
  0x82   :  { %844 = vmatpush1.bf16.msra.mxu1 %v1405_v27  ;;  %1229 = vmatprep.subr.bf16.mxu0 %v1228_v31  ;;  %v890_v27 = vld [vmem:[%s2003_s9 + $0x110] sm:$0xff]  ;;  %v908_v31 = vld [vmem:[%s2003_s9 + $0x1a0] sm:$0xff] }
  0x83   :  { %1261 = vmatprep.subr.bf16.mxu1 %v1260_v33  ;;  %v1234_v33 = vpack.c.bf16 %v859_v22, %v858_v21  ;;  %v1266_v34 = vpack.c.bf16 %v891_v28, %v890_v27  ;;  %v1252_v21 = vpack.c.bf16 %v885_v16, %v884_v15  ;;  %v901_v27 = vld [vmem:[%s2003_s9 + $0x168] sm:$0xff] }
 0x10f   :  { %v149_v36 = vpop.f32.mrb[0].mxu0 }
 0x110   :  { %v190_v37 = vpop.f32.mrb[0].mxu1  ;;  %v151_v38 = vpop.f32.mrb[1].mxu0 }
 0x111   :  { %v192_v39 = vpop.f32.mrb[1].mxu1  ;;  %v153_v40 = vpop.f32.mrb[2].mxu0 }
 0x112   :  { %v194_v41 = vpop.f32.mrb[2].mxu1  ;;  %v154_v42 = vpop.f32.mrb[3].mxu0  ;;  %v893_v40 = vld [vmem:[%s2003_s9 + $0x128] sm:$0xff] }
 0x113   :  { %v195_v43 = vpop.f32.mrb[3].mxu1  ;;  %v878_v41 = vld [vmem:[%s2003_s9 + $0xb0] sm:$0xff]  ;;  %v879_v42 = vld [vmem:[%s2003_s9 + $0xb8] sm:$0xff] }
 0x114   :  { %v910_v43 = vld [vmem:[%s2003_s9 + $0x1b0] sm:$0xff] }
 0x117   :  { %v280_v51 = vpop.f32.mrb[4].mxu0 }
 0x118   :  { %v321_v52 = vpop.f32.mrb[4].mxu1  ;;  %v281_v55 = vadd.f32 %v280_v51, %v149_v36  ;;  %v282_v57 = vpop.f32.mrb[5].mxu0  ;;  %v861_v36 = vld [vmem:[%s2003_s9 + $0x28] sm:$0xff]  ;;  %v1240_v51 = vpack.c.bf16 %v879_v42, %v878_v41  ;;  %v394_v41 = vld [vmem:[%s2000_s6] sm:$0x3] }
 0x119   :  { %v322_v56 = vadd.f32 %v321_v52, %v190_v37  ;;  %v323_v58 = vpop.f32.mrb[5].mxu1  ;;  %v283_v59 = vadd.f32 %v282_v57, %v151_v38  ;;  %v284_v61 = vpop.f32.mrb[6].mxu0  ;;  %v1236_v37 = vpack.c.bf16 %v877_v30, %v876_v29  ;;  %v1268_v38 = vpack.c.bf16 %v909_v32, %v908_v31  ;;  %v912_v57 = vld [vmem:[%s2003_s9 + $0x1c0] sm:$0xff]  ;;  %v886_v29 = vld [vmem:[%s2003_s9 + $0xf0] sm:$0xff]  ;;  %v887_v30 = vld [vmem:[%s2003_s9 + $0xf8] sm:$0xff] }
 0x11a   :  { %v324_v60 = vadd.f32 %v323_v58, %v192_v39  ;;  %v325_v62 = vpop.f32.mrb[6].mxu1  ;;  %v350_v63 = vadd.f32 %v333_v49, %v281_v55  ;;  %v285_v1 = vpop.f32.mrb[7].mxu0  ;;  %v892_v39 = vld [vmem:[%s2003_s9 + $0x120] sm:$0xff]  ;;  %v1238_v46 = vpack.c.bf16 %v861_v36, %v860_v35  ;;  %v862_v49 = vld [vmem:[%s2003_s9 + $0x30] sm:$0xff]  ;;  %v1272_v52 = vpack.c.bf16 %v911_v45, %v910_v43  ;;  %v913_v58 = vld [vmem:[%s2003_s9 + $0x1c8] sm:$0xff] }
 0x11b   :  { %v352_v0 = vadd.f32 %v341_v50, %v322_v56  ;;  %v326_v2 = vpop.f32.mrb[7].mxu1  ;;  %v351_v3 = vadd.f32 %v337_v53, %v283_v59  ;;  %v1270_v48 = vpack.c.bf16 %v893_v40, %v892_v39  ;;  %v863_v50 = vld [vmem:[%s2003_s9 + $0x38] sm:$0xff]  ;;  %v894_v53 = vld [vmem:[%s2003_s9 + $0x130] sm:$0xff]  ;;  %v880_v55 = vld [vmem:[%s2003_s9 + $0xc0] sm:$0xff]  ;;  %v1256_v32 = vpack.c.bf16 %v887_v30, %v886_v29 }
 0x11c   :  { %v353_v4 = vadd.f32 %v345_v54, %v324_v60  ;;  %v354_v7 = vmax.f32 %v350_v63, 0.0  ;;  %v895_v54 = vld [vmem:[%s2003_s9 + $0x138] sm:$0xff]  ;;  %v881_v56 = vld [vmem:[%s2003_s9 + $0xc8] sm:$0xff]  ;;  %v1242_v59 = vpack.c.bf16 %v863_v50, %v862_v49  ;;  %v864_v61 = vld [vmem:[%s2003_s9 + $0x40] sm:$0xff]  ;;  %v399_v43 = vrot.slane %v394_v41, %v1789_v44 }
 0x11d   :  { %v356_v8 = vmax.f32 %v352_v0, 0.0  ;;  %v355_v12 = vmax.f32 %v351_v3, 0.0  ;;  %v1274_v60 = vpack.c.bf16 %v895_v54, %v894_v53  ;;  %v865_v62 = vld [vmem:[%s2003_s9 + $0x48] sm:$0xff]  ;;  %v1244_v63 = vpack.c.bf16 %v881_v56, %v880_v55  ;;  %v896_v1 = vld [vmem:[%s2003_s9 + $0x140] sm:$0xff]  ;;  %v882_v3 = vld [vmem:[%s2003_s9 + $0xd0] sm:$0xff] }
 0x11e   :  { %v357_v13 = vmax.f32 %v353_v4, 0.0  ;;  %v358_v23 = vpack.c.bf16 %v354_v7, %v354_v7  ;;  %v1276_v0 = vpack.c.bf16 %v913_v58, %v912_v57  ;;  %v897_v2 = vld [vmem:[%s2003_s9 + $0x148] sm:$0xff]  ;;  %v883_v4 = vld [vmem:[%s2003_s9 + $0xd8] sm:$0xff]  ;;  %v1246_v7 = vpack.c.bf16 %v865_v62, %v864_v61  ;;  %v918_v31 = vld [vmem:[%s2003_s9 + $0x1f0] sm:$0xff] }
 0x11f   :  { %v359_v17 = vpack.c.bf16 %v355_v12, %v355_v12  ;;  %v360_v24 = vpack.c.bf16 %v356_v8, %v356_v8  ;;  %v1278_v8 = vpack.c.bf16 %v897_v2, %v896_v1  ;;  %v1248_v11 = vpack.c.bf16 %v883_v4, %v882_v3  ;;  %v871_v35 = vld [vmem:[%s2003_s9 + $0x78] sm:$0xff]  ;;  %v641_v42 = vld [vmem:[%s2002_s8] sm:$0x3] }
 0x120   :  { %v361_v18 = vpack.c.bf16 %v357_v13, %v357_v13  ;;  %v1280_v12 = vpack.c.bf16 %v915_v6, %v914_v5  ;;  %v898_v13 = vld [vmem:[%s2003_s9 + $0x150] sm:$0xff]  ;;  %v903_v39 = vld [vmem:[%s2003_s9 + $0x178] sm:$0xff]  ;;  %v646_v45 = vrot.slane %v641_v42, %v1789_v44  ;;  %v1157_v1 = vld [vmem:[%s2004_s10] ss:$0 sm:$0xff] }
 0x121   :  { %598 = vmatprep.mubr.bf16.mxu0 %v359_v17  ;;  %v916_v17 = vld [vmem:[%s2003_s9 + $0x1e0] sm:$0xff] }
 0x122   :  { %845 = vmatprep.mubr.bf16.mxu1 %v361_v18  ;;  %599 = vmatmul.mubr.bf16.vlgmr.msra.gmra.mrb[8].mxu0 %v358_v23  ;;  %v917_v18 = vld [vmem:[%s2003_s9 + $0x1e8] sm:$0xff]  ;;  %v868_v23 = vld [vmem:[%s2003_s9 + $0x60] sm:$0xff] }
 0x123   :  { %846 = vmatmul.mubr.bf16.vlgmr.msra.gmra.mrb[8].mxu1 %v360_v24  ;;  %1231 = vmatpush3.bf16.msra.mxu0 %v1230_v19  ;;  %v1250_v19 = vpack.c.bf16 %v867_v10, %v866_v9  ;;  %v1284_v22 = vpack.c.bf16 %v917_v18, %v916_v17  ;;  %v869_v24 = vld [vmem:[%s2003_s9 + $0x68] sm:$0xff] }
 0x124   :  { %1263 = vmatpush3.bf16.msra.mxu1 %v1262_v20  ;;  %1233 = vmatprep.subr.bf16.mxu0 %v1232_v25  ;;  %v1282_v20 = vpack.c.bf16 %v899_v14, %v898_v13  ;;  %v900_v25 = vld [vmem:[%s2003_s9 + $0x160] sm:$0xff] }
 0x125   :  { %1265 = vmatprep.subr.bf16.mxu1 %v1264_v26  ;;  %v1254_v26 = vpack.c.bf16 %v869_v24, %v868_v23  ;;  %v1286_v28 = vpack.c.bf16 %v901_v27, %v900_v25 }
 0x127   :  { %1235 = vmatpush3.bf16.msra.mxu0 %v1234_v33  ;;  %v919_v33 = vld [vmem:[%s2003_s9 + $0x1f8] sm:$0xff] }
 0x128   :  { %1267 = vmatpush3.bf16.msra.mxu1 %v1266_v34  ;;  %1237 = vmatprep.subr.bf16.mxu0 %v1236_v37  ;;  %v870_v34 = vld [vmem:[%s2003_s9 + $0x70] sm:$0xff]  ;;  %v1288_v36 = vpack.c.bf16 %v919_v33, %v918_v31 }
 0x129   :  { %1269 = vmatprep.subr.bf16.mxu1 %v1268_v38  ;;  %v1258_v37 = vpack.c.bf16 %v871_v35, %v870_v34  ;;  %v902_v38 = vld [vmem:[%s2003_s9 + $0x170] sm:$0xff] }
 0x12a   :  { %v1290_v40 = vpack.c.bf16 %v903_v39, %v902_v38 }
 0x12b   :  { %1239 = vmatpush3.bf16.msra.mxu0 %v1238_v46  ;;  %v403_v46 = vrot.slane %v394_v41, %v1794_v47 }
 0x12c   :  { %1271 = vmatpush3.bf16.msra.mxu1 %v1270_v48  ;;  %1241 = vmatprep.subr.bf16.mxu0 %v1240_v51  ;;  %v650_v48 = vrot.slane %v641_v42, %v1794_v47 }
 0x12d   :  { %1273 = vmatprep.subr.bf16.mxu1 %v1272_v52 }
 0x12f   :  { %1243 = vmatpush3.bf16.msra.mxu0 %v1242_v59 }
 0x130   :  { %1275 = vmatpush3.bf16.msra.mxu1 %v1274_v60  ;;  %1245 = vmatprep.subr.bf16.mxu0 %v1244_v63 }
 0x131   :  { %1277 = vmatprep.subr.bf16.mxu1 %v1276_v0 }
 0x133   :  { %1247 = vmatpush3.bf16.msra.mxu0 %v1246_v7 }
 0x134   :  { %1279 = vmatpush3.bf16.msra.mxu1 %v1278_v8  ;;  %1249 = vmatprep.subr.bf16.mxu0 %v1248_v11 }
 0x135   :  { %1281 = vmatprep.subr.bf16.mxu1 %v1280_v12 }
 0x137   :  { %1251 = vmatpush3.bf16.msra.mxu0 %v1250_v19 }
 0x138   :  { %1283 = vmatpush3.bf16.msra.mxu1 %v1282_v20  ;;  %1253 = vmatprep.subr.bf16.mxu0 %v1252_v21 }
 0x139   :  { %1285 = vmatprep.subr.bf16.mxu1 %v1284_v22 }
 0x13b   :  { %1255 = vmatpush3.bf16.msra.mxu0 %v1254_v26 }
 0x13c   :  { %1287 = vmatpush3.bf16.msra.mxu1 %v1286_v28  ;;  %1257 = vmatprep.subr.bf16.mxu0 %v1256_v32 }
 0x13d   :  { %1289 = vmatprep.subr.bf16.mxu1 %v1288_v36 }
 0x13f   :  { %1259 = vmatpush3.bf16.msra.mxu0 %v1258_v37 }
 0x140   :  { %1291 = vmatpush3.bf16.msra.mxu1 %v1290_v40 }
 0x1f5   :  { %v600_v49 = vpop.f32.mrb[8].mxu0 }
 0x1f6   :  { %v847_v50 = vpop.f32.mrb[8].mxu1  ;;  %v601_v51 = vadd.f32 %v600_v49, %v399_v43  ;;  %v602_v53 = vpop.f32.mrb[9].mxu0 }
 0x1f7   :  { %v848_v52 = vadd.f32 %v847_v50, %v646_v45  ;;  %v849_v54 = vpop.f32.mrb[9].mxu1  ;;  %v603_v55 = vadd.f32 %v602_v53, %v403_v46  ;;  %v604_v57 = vpop.f32.mrb[10].mxu0 }
 0x1f8   :  { %v850_v56 = vadd.f32 %v849_v54, %v650_v48  ;;  %v851_v58 = vpop.f32.mrb[10].mxu1  ;;  %v605_v59 = vpop.f32.mrb[11].mxu0  ;;  %v607_v63 = vmax.f32 %v601_v51, 0.0 }
 0x1f9   :  { %v852_v60 = vpop.f32.mrb[11].mxu1  ;;  %v608_v61 = vmax.f32 %v603_v55, 0.0  ;;  %v854_v44 = vmax.f32 %v848_v52, 0.0 }
 0x1fa   :  { %v855_v62 = vmax.f32 %v850_v56, 0.0 }
 0x1fb   :  { %991 = vmatprep.mubr.f32.mxu0 %v608_v61 }
 0x1fc   :  { %1061 = vmatprep.mubr.f32.mxu1 %v855_v62  ;;  %992 = vmatmul.mubr.f32.vlgmr.msra.gmra.mrb[12].mxu0 %v607_v63 }
 0x1fd   :  { %1062 = vmatmul.mubr.f32.vlgmr.msra.gmra.mrb[12].mxu1 %v854_v44 }
 0x2cf   :  { %v1190_v47 = vpop.f32.mrb[12].mxu0 }
 0x2d0   :  { %v1225_v0 = vpop.f32.mrb[12].mxu1  ;;  %v1191_v2 = vpop.f32.mrb[13].mxu0 }
 0x2d1   :  { %v1226_v3 = vpop.f32.mrb[13].mxu1  ;;  %v1192_v4 = vadd.f32 %v1191_v2, %v1190_v47 }
 0x2d2   :  { %v1227_v5 = vadd.f32 %v1226_v3, %v1225_v0 }
 0x2d3   :  { %v994_v6 = vadd.f32 %v1192_v4, %v1157_v1 }
 0x2d5   :  { %v1064_v7 = vadd.f32 %v1227_v5, %v994_v6 }
 0x2d7   :  { %1068 = vst.msk [vmem:[%s2005_s11] sm:$0xff] %vm1067_vm4, %v1064_v7 }
 0x2d8   :  { %1073 = vsyncpa [#allocation3], 1 }
 0x2d9   :  { %1074 = vsyncpa [#allocation5], 1 }

</bundles_post_ra>
